<compile_context>
chip_gen: v6e
topology: v6e:2x2x1
jax: 0.10.0
libtpu: 0.0.40
codegen_flags: <defaults>
</compile_context>

<pallas_src>
import math
from functools import partial

import jax
import jax.numpy as jnp
from jax.experimental import pallas as pl
from jax.experimental.pallas import tpu as pltpu

LANE = 128


def _round_up(n, m):
    return ((n + m - 1) // m) * m


def _gelu_exact(x):
    # Matches torch.nn.GELU() default (erf formulation). Kept exact for parity with the
    # PyTorch module; a tanh-approx variant would shift work to the EUP slot but changes
    # numerics, so we do not switch silently.
    return 0.5 * x * (1.0 + jax.lax.erf(x * (1.0 / math.sqrt(2.0))))


def _mlp_kernel(num_layers, x_ref, *refs):
    # refs = (w0, b0, w1, b1, ..., w_proj, b_proj, out_ref)
    o_ref = refs[-1]
    p_refs = refs[:-1]

    h = x_ref[...]  # bf16 (TM, in_pad)

    # Hidden LinearBlocks: Linear -> GELU. bf16 MXU matmuls with f32 accumulation.
    for i in range(num_layers - 1):
        w = p_refs[2 * i][...]        # bf16 (d_in_pad, d_out_pad)
        b = p_refs[2 * i + 1][...]    # f32  (1, d_out_pad)
        z = jnp.dot(h, w, preferred_element_type=jnp.float32) + b
        h = _gelu_exact(z).astype(w.dtype)   # back to bf16 for the next MXU pass

    # Dropout(p=0.0) is the identity.
    # TODO(synk): dropout with p > 0 (training mode) would need pltpu.prng_* masking.

    # Final projection: wp is zero-padded to 128 output lanes so the result block is
    # lane-dense and the store is an unmasked full-lane vst; only column 0 is meaningful.
    wp = p_refs[2 * (num_layers - 1)][...]       # bf16 (hidden_pad, 128)
    bp = p_refs[2 * (num_layers - 1) + 1][...]   # f32  (1, 128)
    o_ref[...] = (jnp.dot(h, wp, preferred_element_type=jnp.float32) + bp).astype(o_ref.dtype)


def mlp_regressor_forward(x, params, *, tile_m=256):
    """MLPRegressor forward.

    x: (B, in_channels) f32.
    params: list of (w, b); w is (in, out) (transpose of nn.Linear weight), b is (1, out).
            The last (w, b) pair is the projection layer (out == 1).
    Returns (B, 1) f32.
    """
    B, in_ch = x.shape
    num_layers = len(params)

    # Batch tile: multiple of 16 sublanes (bf16 packing), capped at tile_m.
    tm = min(tile_m, _round_up(B, 16))
    b_pad = _round_up(B, tm)

    # Zero-pad feature dims to 128 lanes and cast MXU operands to bf16
    # (halves activation DMA traffic as well).
    in_pad = _round_up(in_ch, LANE)
    x_p = jnp.pad(x, ((0, b_pad - B), (0, in_pad - in_ch))).astype(jnp.bfloat16)

    flat_args = [x_p]
    d_in_pad = in_pad
    for (w, b) in params:
        d_in, d_out = w.shape
        d_out_pad = _round_up(d_out, LANE)   # projection (out=1) also padded to 128
        w_p = jnp.pad(w, ((0, d_in_pad - d_in), (0, d_out_pad - d_out))).astype(jnp.bfloat16)
        b_p = jnp.pad(b, ((0, 0), (0, d_out_pad - d_out)))   # bias stays f32
        flat_args.extend([w_p, b_p])
        d_in_pad = d_out_pad
    out_pad = d_in_pad   # lane-dense output width (128)

    grid = (b_pad // tm,)
    # x streams per batch tile; weights/biases are VMEM-resident (same block every step,
    # fetched once -- no re-DMA per grid iteration).
    in_specs = [pl.BlockSpec((tm, in_pad), lambda i: (i, 0))]
    for a in flat_args[1:]:
        in_specs.append(pl.BlockSpec(a.shape, lambda i: (0, 0)))
    out_specs = pl.BlockSpec((tm, out_pad), lambda i: (i, 0))

    out_padded = pl.pallas_call(
        partial(_mlp_kernel, num_layers),
        out_shape=jax.ShapeDtypeStruct((b_pad, out_pad), jnp.float32),
        grid=grid,
        in_specs=in_specs,
        out_specs=out_specs,
        compiler_params=pltpu.CompilerParams(
            # Independent batch tiles -> shard across TensorCores on v7x megacore.
            dimension_semantics=("parallel",),
        ),
    )(*flat_args)

    return out_padded[:B, :1]


def init_params(key, in_channels, sizes):
    """Deterministic PyTorch-style (Kaiming-uniform-ish) init of all Linear layers."""
    dims = [in_channels] + list(sizes)
    params = []
    for i in range(len(sizes)):
        key, kw, kb = jax.random.split(key, 3)
        bound = 1.0 / math.sqrt(dims[i])
        w = jax.random.uniform(kw, (dims[i], dims[i + 1]), jnp.float32, -bound, bound)
        b = jax.random.uniform(kb, (1, dims[i + 1]), jnp.float32, -bound, bound)
        params.append((w, b))
    # project: Linear(sizes[-1], 1)
    key, kw, kb = jax.random.split(key, 3)
    bound = 1.0 / math.sqrt(sizes[-1])
    wp = jax.random.uniform(kw, (sizes[-1], 1), jnp.float32, -bound, bound)
    bp = jax.random.uniform(kb, (1, 1), jnp.float32, -bound, bound)
    params.append((wp, bp))
    return params


def _reference_forward(x, params, compute_dtype=jnp.float32):
    """Pure-JAX reference; compute_dtype selects matmul-operand precision."""
    h = x.astype(compute_dtype)
    for w, b in params[:-1]:
        z = jnp.dot(h, w.astype(compute_dtype), preferred_element_type=jnp.float32) + b
        h = _gelu_exact(z).astype(compute_dtype)
    wp, bp = params[-1]
    return jnp.dot(h, wp.astype(compute_dtype), preferred_element_type=jnp.float32) + bp


if __name__ == "__main__":
    # Small shapes consistent with the module: MLPRegressor(in_channels=32, sizes=[64, 32])
    batch = 8
    in_channels = 32
    sizes = [64, 32]

    key = jax.random.PRNGKey(0)
    key, kx = jax.random.split(key)
    x = jax.random.normal(kx, (batch, in_channels), dtype=jnp.float32)
    params = init_params(key, in_channels, sizes)

    out = mlp_regressor_forward(x, params)
    out = jax.block_until_ready(out)
    assert out.shape == (batch, 1), out.shape

    # Check against a bf16-operand reference (same precision as the kernel's MXU inputs)...
    ref_bf16 = _reference_forward(x, params, jnp.bfloat16)
    assert jnp.allclose(out, ref_bf16, atol=2e-3, rtol=2e-3), "mismatch vs bf16-matched reference"
    # ...and against the full-f32 reference with a bf16-appropriate tolerance.
    ref_f32 = _reference_forward(x, params, jnp.float32)
    assert jnp.allclose(out, ref_f32, atol=3e-2, rtol=3e-2), "mismatch vs f32 reference"

    print("KERNEL_OK")
</pallas_src>

<mosaic_0001>
module attributes {stable_mosaic.version = 11 : i64} {
  func.func @_mlp_kernel(%arg0: i32, %arg1: memref<16x128xbf16, #tpu.memory_space<vmem>>, %arg2: memref<128x128xbf16, #tpu.memory_space<vmem>>, %arg3: memref<1x128xf32, #tpu.memory_space<vmem>>, %arg4: memref<128x128xbf16, #tpu.memory_space<vmem>>, %arg5: memref<1x128xf32, #tpu.memory_space<vmem>>, %arg6: memref<128x128xbf16, #tpu.memory_space<vmem>>, %arg7: memref<1x128xf32, #tpu.memory_space<vmem>>, %arg8: memref<16x128xf32, #tpu.memory_space<vmem>>) attributes {dimension_semantics = [#tpu.dimension_semantics<parallel>], iteration_bounds = array<i64: 1>, scalar_prefetch = 0 : i64, scratch_operands = 0 : i64, tpu.core_type = #tpu.core_type<tc>, window_params = [{transform_indices = @transform_0, window_bounds = array<i64: 16, 128>}, {pipeline_mode = #tpu.pipeline_mode<synchronous>, transform_indices = @transform_1, window_bounds = array<i64: 128, 128>}, {pipeline_mode = #tpu.pipeline_mode<synchronous>, transform_indices = @transform_2, window_bounds = array<i64: 1, 128>}, {pipeline_mode = #tpu.pipeline_mode<synchronous>, transform_indices = @transform_3, window_bounds = array<i64: 128, 128>}, {pipeline_mode = #tpu.pipeline_mode<synchronous>, transform_indices = @transform_4, window_bounds = array<i64: 1, 128>}, {pipeline_mode = #tpu.pipeline_mode<synchronous>, transform_indices = @transform_5, window_bounds = array<i64: 128, 128>}, {pipeline_mode = #tpu.pipeline_mode<synchronous>, transform_indices = @transform_6, window_bounds = array<i64: 1, 128>}, {transform_indices = @transform_7, window_bounds = array<i64: 16, 128>}]} {
    %c0 = arith.constant 0 : index
    %c0_0 = arith.constant 0 : index
    %0 = vector.load %arg1[%c0, %c0_0] : memref<16x128xbf16, #tpu.memory_space<vmem>>, vector<16x128xbf16>
    %c0_1 = arith.constant 0 : index
    %c0_2 = arith.constant 0 : index
    %1 = vector.load %arg2[%c0_1, %c0_2] : memref<128x128xbf16, #tpu.memory_space<vmem>>, vector<128x128xbf16>
    %c0_3 = arith.constant 0 : index
    %c0_4 = arith.constant 0 : index
    %2 = vector.load %arg3[%c0_3, %c0_4] : memref<1x128xf32, #tpu.memory_space<vmem>>, vector<1x128xf32>
    %cst = arith.constant dense<0.000000e+00> : vector<16x128xf32>
    %3 = tpu.matmul %0, %1, %cst {dimension_numbers = #tpu.dot_dimension_numbers<[1], [0], [0], [1], [0, 0, 1, 1], [], []>} : vector<16x128xbf16>, vector<128x128xbf16>, vector<16x128xf32> -> vector<16x128xf32>
    %4 = vector.broadcast %2 : vector<1x128xf32> to vector<16x128xf32>
    %5 = arith.addf %3, %4 : vector<16x128xf32>
    %cst_5 = arith.constant 5.000000e-01 : f32
    %6 = vector.broadcast %cst_5 : f32 to vector<16x128xf32>
    %7 = arith.mulf %6, %5 : vector<16x128xf32>
    %cst_6 = arith.constant 0.707106769 : f32
    %8 = vector.broadcast %cst_6 : f32 to vector<16x128xf32>
    %9 = arith.mulf %5, %8 : vector<16x128xf32>
    %10 = math.erf %9 : vector<16x128xf32>
    %cst_7 = arith.constant 1.000000e+00 : f32
    %11 = vector.broadcast %cst_7 : f32 to vector<16x128xf32>
    %12 = arith.addf %11, %10 : vector<16x128xf32>
    %13 = arith.mulf %7, %12 : vector<16x128xf32>
    %14 = arith.truncf %13 : vector<16x128xf32> to vector<16x128xbf16>
    %c0_8 = arith.constant 0 : index
    %c0_9 = arith.constant 0 : index
    %15 = vector.load %arg4[%c0_8, %c0_9] : memref<128x128xbf16, #tpu.memory_space<vmem>>, vector<128x128xbf16>
    %c0_10 = arith.constant 0 : index
    %c0_11 = arith.constant 0 : index
    %16 = vector.load %arg5[%c0_10, %c0_11] : memref<1x128xf32, #tpu.memory_space<vmem>>, vector<1x128xf32>
    %cst_12 = arith.constant dense<0.000000e+00> : vector<16x128xf32>
    %17 = tpu.matmul %14, %15, %cst_12 {dimension_numbers = #tpu.dot_dimension_numbers<[1], [0], [0], [1], [0, 0, 1, 1], [], []>} : vector<16x128xbf16>, vector<128x128xbf16>, vector<16x128xf32> -> vector<16x128xf32>
    %18 = vector.broadcast %16 : vector<1x128xf32> to vector<16x128xf32>
    %19 = arith.addf %17, %18 : vector<16x128xf32>
    %cst_13 = arith.constant 5.000000e-01 : f32
    %20 = vector.broadcast %cst_13 : f32 to vector<16x128xf32>
    %21 = arith.mulf %20, %19 : vector<16x128xf32>
    %cst_14 = arith.constant 0.707106769 : f32
    %22 = vector.broadcast %cst_14 : f32 to vector<16x128xf32>
    %23 = arith.mulf %19, %22 : vector<16x128xf32>
    %24 = math.erf %23 : vector<16x128xf32>
    %cst_15 = arith.constant 1.000000e+00 : f32
    %25 = vector.broadcast %cst_15 : f32 to vector<16x128xf32>
    %26 = arith.addf %25, %24 : vector<16x128xf32>
    %27 = arith.mulf %21, %26 : vector<16x128xf32>
    %28 = arith.truncf %27 : vector<16x128xf32> to vector<16x128xbf16>
    %c0_16 = arith.constant 0 : index
    %c0_17 = arith.constant 0 : index
    %29 = vector.load %arg6[%c0_16, %c0_17] : memref<128x128xbf16, #tpu.memory_space<vmem>>, vector<128x128xbf16>
    %c0_18 = arith.constant 0 : index
    %c0_19 = arith.constant 0 : index
    %30 = vector.load %arg7[%c0_18, %c0_19] : memref<1x128xf32, #tpu.memory_space<vmem>>, vector<1x128xf32>
    %cst_20 = arith.constant dense<0.000000e+00> : vector<16x128xf32>
    %31 = tpu.matmul %28, %29, %cst_20 {dimension_numbers = #tpu.dot_dimension_numbers<[1], [0], [0], [1], [0, 0, 1, 1], [], []>} : vector<16x128xbf16>, vector<128x128xbf16>, vector<16x128xf32> -> vector<16x128xf32>
    %32 = vector.broadcast %30 : vector<1x128xf32> to vector<16x128xf32>
    %33 = arith.addf %31, %32 : vector<16x128xf32>
    %c0_21 = arith.constant 0 : index
    %c0_22 = arith.constant 0 : index
    %34 = vector.load %arg8[%c0_21, %c0_22] : memref<16x128xf32, #tpu.memory_space<vmem>>, vector<16x128xf32>
    tpu.vector_store %arg8[%c0_21, %c0_22], %33 {strides = array<i32>} : memref<16x128xf32, #tpu.memory_space<vmem>>, vector<16x128xf32>,
    return
  }
  func.func @transform_0(%arg0: i32) -> (i32, i32) {
    %c0_i32 = arith.constant 0 : i32
    %c0_i32_0 = arith.constant 0 : i32
    return %arg0, %c0_i32 : i32, i32
  }
  func.func @transform_1(%arg0: i32) -> (i32, i32) {
    %c0_i32 = arith.constant 0 : i32
    %c0_i32_0 = arith.constant 0 : i32
    %c0_i32_1 = arith.constant 0 : i32
    return %c0_i32, %c0_i32_0 : i32, i32
  }
  func.func @transform_2(%arg0: i32) -> (i32, i32) {
    %c0_i32 = arith.constant 0 : i32
    %c0_i32_0 = arith.constant 0 : i32
    %c0_i32_1 = arith.constant 0 : i32
    return %c0_i32, %c0_i32_0 : i32, i32
  }
  func.func @transform_3(%arg0: i32) -> (i32, i32) {
    %c0_i32 = arith.constant 0 : i32
    %c0_i32_0 = arith.constant 0 : i32
    %c0_i32_1 = arith.constant 0 : i32
    return %c0_i32, %c0_i32_0 : i32, i32
  }
  func.func @transform_4(%arg0: i32) -> (i32, i32) {
    %c0_i32 = arith.constant 0 : i32
    %c0_i32_0 = arith.constant 0 : i32
    %c0_i32_1 = arith.constant 0 : i32
    return %c0_i32, %c0_i32_0 : i32, i32
  }
  func.func @transform_5(%arg0: i32) -> (i32, i32) {
    %c0_i32 = arith.constant 0 : i32
    %c0_i32_0 = arith.constant 0 : i32
    %c0_i32_1 = arith.constant 0 : i32
    return %c0_i32, %c0_i32_0 : i32, i32
  }
  func.func @transform_6(%arg0: i32) -> (i32, i32) {
    %c0_i32 = arith.constant 0 : i32
    %c0_i32_0 = arith.constant 0 : i32
    %c0_i32_1 = arith.constant 0 : i32
    return %c0_i32, %c0_i32_0 : i32, i32
  }
  func.func @transform_7(%arg0: i32) -> (i32, i32) {
    %c0_i32 = arith.constant 0 : i32
    %c0_i32_0 = arith.constant 0 : i32
    return %arg0, %c0_i32 : i32, i32
  }
}

</mosaic_0001>

<bundles_post_ra>
// kernel: tpu_custom_call.1
= control target key start
LH: loop header
LB: loop body
LE: loop exit
PB: predicated region body
PF: predicated region fallthrough
CT: control target
= control target key end

     0   :  { %12 = vsyncpa [#allocation3], 0  ;;  %s854_s0 = inlined_call_operand.hbm [shape: bf16[16,128], index: 0, kind: input, shape index: {}]   ;;  %s855_s1 = inlined_call_operand.hbm [shape: bf16[128,128], index: 1, kind: input, shape index: {}]   ;;  %s856_s2 = inlined_call_operand.vmem [shape: f32[1,128], index: 2, kind: input, shape index: {}]   ;;  %s857_s3 = inlined_call_operand.hbm [shape: bf16[128,128], index: 3, kind: input, shape index: {}]   ;;  %s858_s4 = inlined_call_operand.vmem [shape: f32[1,128], index: 4, kind: input, shape index: {}]   ;;  %s859_s5 = inlined_call_operand.hbm [shape: bf16[128,128], index: 5, kind: input, shape index: {}]   ;;  %s860_s6 = inlined_call_operand.vmem [shape: f32[1,128], index: 6, kind: input, shape index: {}]   ;;  %s861_s7 = inlined_call_operand.hbm [shape: f32[16,128], index: 7, kind: output, shape index: {}]  }
   0x1   :  { %13 = vsyncpa [#allocation6], 0 }
   0x2   :  { %14 = vsyncpa [#allocation9], 0 }
   0x3   :  { %15 = vsyncpa [#allocation4], 0  ;;  %s737_s24 = smov [#allocation5]   ;;  %s738_s26 = smov [#allocation2]  }
   0x4   :  { %s33_s25 = sshll.u32 %s737_s24, 4  ;;  %s21_s27 = sshll.u32 %s738_s26, 4  ;;  %s34_s25 = int_to_ptr.vmem [resolvable:$true] %s33_s25  ;;  %s22_s27 = int_to_ptr.vmem [resolvable:$true] %s21_s27 }
   0x5   :  { %s637_s28 = scalar_lea.vmem %s34_s25, 1024  ;;  %p642_p1 = scmp.lt.s32.totalorder %s34_s25, %s34_s25 }
   0x6   :  { %p638_p0 = scmp.ne.s32.totalorder %s34_s25, %s637_s28  ;;  %p643_p2 = scmp.lt.s32.totalorder %s637_s28, %s637_s28 }
   0x8   :  { %p644_p3 = por %p643_p2, %p642_p1 }
   0xa   :  { %p645_p4 = pnand %p644_p3, %p638_p0 }
   0xc   :  { %648 = shalt.err (!%p645_p4)
}
   0xd   :  { %s739_s29 = smov 64   ;;  %s740_s30 = smov 4  }
   0xe   :  { %39 = dma.hbm_to_vmem [thread:$0]  %s855_s1, 1024, %s34_s25, [#allocation6], %s739_s29, %s739_s29, %s740_s30  }
   0xf   :  { %s657_s10 = scalar_lea.vmem %s22_s27, 128  ;;  %p662_p6 = scmp.lt.s32.totalorder %s22_s27, %s22_s27 }
  0x10   :  { %p658_p5 = scmp.ne.s32.totalorder %s22_s27, %s657_s10  ;;  %p663_p7 = scmp.lt.s32.totalorder %s657_s10, %s657_s10 }
  0x12   :  { %p664_p8 = por %p663_p7, %p662_p6 }
  0x14   :  { %p665_p9 = pnand %p664_p8, %p658_p5 }
  0x16   :  { %668 = shalt.err (!%p665_p9)
}
  0x17   :  { %27 = dma.hbm_to_vmem [thread:$0]  %s854_s0, 128, %s22_s27, [#allocation3], %s739_s29, %s739_s29, %s740_s30  }
  0x18   :  { %s741_s13 = smov [#allocation7]   ;;  %s742_s15 = smov [#allocation8]  }
  0x19   :  { %s47_s14 = sshll.u32 %s741_s13, 4  ;;  %s61_s16 = sshll.u32 %s742_s15, 4  ;;  %s48_s14 = int_to_ptr.vmem [resolvable:$true] %s47_s14  ;;  %s62_s16 = int_to_ptr.vmem [resolvable:$true] %s61_s16 }
  0x1a   :  { %s677_s1 = scalar_lea.vmem %s48_s14, 1024  ;;  %p682_p11 = scmp.lt.s32.totalorder %s48_s14, %s48_s14 }
  0x1b   :  { %p678_p10 = scmp.ne.s32.totalorder %s48_s14, %s677_s1  ;;  %p683_p12 = scmp.lt.s32.totalorder %s677_s1, %s677_s1 }
  0x1d   :  { %p684_p13 = por %p683_p12, %p682_p11 }
  0x1f   :  { %p685_p0 = pnand %p684_p13, %p678_p10 }
  0x21   :  { %688 = shalt.err (!%p685_p0)
}
  0x22   :  { %53 = dma.hbm_to_vmem [thread:$0]  %s857_s3, 1024, %s48_s14, [#allocation6], %s739_s29, %s739_s29, %s740_s30  }
  0x23   :  { %s697_s0 = scalar_lea.vmem %s62_s16, 1024  ;;  %p702_p2 = scmp.lt.s32.totalorder %s62_s16, %s62_s16 }
  0x24   :  { %p698_p1 = scmp.ne.s32.totalorder %s62_s16, %s697_s0  ;;  %p703_p3 = scmp.lt.s32.totalorder %s697_s0, %s697_s0 }
  0x26   :  { %p704_p4 = por %p703_p3, %p702_p2 }
  0x28   :  { %p705_p5 = pnand %p704_p4, %p698_p1 }
  0x2a   :  { %708 = shalt.err (!%p705_p5)
}
  0x2b   :  { %67 = dma.hbm_to_vmem [thread:$0]  %s859_s5, 1024, %s62_s16, [#allocation9], %s739_s29, %s739_s29, %s740_s30  }
  0x2c   :  { %729 = dma.done.wait [#allocation3], 128  }
  0x2d   :  { %730 = vsyncadd [#allocation3], 4294967168 }
  0x2e   :  { %731 = dma.done.wait [#allocation6], 2048  }
  0x2f   :  { %732 = vsyncadd [#allocation6], 4294965248 }
  0x30   :  { %733 = dma.done.wait [#allocation9], 1024  }
  0x31   :  { %734 = vsyncadd [#allocation9], 4294966272  ;;  %v743_v0 = vmov 0.0   ;;  %vm744_vm0 = vmmov 0   ;;  %v596_v1 = vld [vmem:[#allocation5 + $0x38] sm:$0xff]   ;;  %v597_v2 = vld [vmem:[#allocation5 + $0x30] sm:$0xff]  }
  0x32   :  { %525 = vmatprep.subr.bf16.mxu0 %v743_v0  ;;  %541 = vmatprep.mubr.msk.bf16.mxu0 %vm744_vm0, %v743_v0  ;;  %v598_v3 = vld [vmem:[#allocation5 + $0x28] sm:$0xff]   ;;  %v605_v4 = vld [vmem:[#allocation7 + $0x38] sm:$0xff]   ;;  %v599_v5 = vld [vmem:[#allocation5 + $0x20] sm:$0xff]   ;;  %s745_s23 = smov [#allocation10]  }
  0x33   :  { %545 = vmatprep.subr.bf16.mxu1 %v743_v0  ;;  %561 = vmatprep.mubr.msk.bf16.mxu1 %vm744_vm0, %v743_v0  ;;  %v600_v6 = vld [vmem:[#allocation5 + $0x18] sm:$0xff]   ;;  %v601_v7 = vld [vmem:[#allocation5 + $0x10] sm:$0xff]   ;;  %v602_v8 = vld [vmem:[#allocation5 + $0x8] sm:$0xff]   ;;  %s456_s24 = sshll.u32 %s745_s23, 4  ;;  %s457_s24 = int_to_ptr.vmem [resolvable:$true] %s456_s24 }
  0x34   :  { %526 = vmatpush3.bf16.msra.mxu0 %v596_v1  ;;  %546 = vmatpush3.bf16.msra.mxu1 %v605_v4  ;;  %v603_v9 = vld [vmem:[#allocation5] sm:$0xff]   ;;  %v604_v10 = vld [vmem:[#allocation2] sm:$0xff]   ;;  %v606_v11 = vld [vmem:[#allocation7 + $0x30] sm:$0xff]   ;;  %s709_s25 = scalar_lea.vmem %s457_s24, 256  ;;  %p714_p7 = scmp.lt.s32.totalorder %s457_s24, %s457_s24 }
  0x35   :  { %527 = vmatprep.subr.bf16.mxu0 %v743_v0  ;;  %547 = vmatprep.subr.bf16.mxu1 %v743_v0  ;;  %v607_v12 = vld [vmem:[#allocation7 + $0x28] sm:$0xff]   ;;  %v608_v13 = vld [vmem:[#allocation7 + $0x20] sm:$0xff]   ;;  %v609_v14 = vld [vmem:[#allocation7 + $0x18] sm:$0xff]   ;;  %p710_p6 = scmp.ne.s32.totalorder %s457_s24, %s709_s25  ;;  %p715_p8 = scmp.lt.s32.totalorder %s709_s25, %s709_s25 }
  0x36   :  { %v610_v15 = vld [vmem:[#allocation7 + $0x10] sm:$0xff]   ;;  %v611_v16 = vld [vmem:[#allocation7 + $0x8] sm:$0xff]   ;;  %v612_v17 = vld [vmem:[#allocation7] sm:$0xff]  }
  0x37   :  { %v613_v18 = vld [vmem:[#allocation8 + $0x38] sm:$0xff]   ;;  %v614_v37 = vld [vmem:[#allocation8 + $0x30] sm:$0xff]   ;;  %v615_v38 = vld [vmem:[#allocation8 + $0x28] sm:$0xff]   ;;  %p716_p9 = por %p715_p8, %p714_p7 }
  0x38   :  { %528 = vmatpush3.bf16.msra.mxu0 %v597_v2  ;;  %548 = vmatpush3.bf16.msra.mxu1 %v606_v11  ;;  %v470_v19 = vld [vmem:[%s856_s2] ss:$0 sm:$0xff]  ;;  %v616_v39 = vld [vmem:[#allocation8 + $0x20] sm:$0xff]   ;;  %v618_v41 = vld [vmem:[#allocation8 + $0x10] sm:$0xff]  }
  0x39   :  { %529 = vmatprep.subr.bf16.mxu0 %v743_v0  ;;  %549 = vmatprep.subr.bf16.mxu1 %v743_v0  ;;  %v617_v40 = vld [vmem:[#allocation8 + $0x18] sm:$0xff]   ;;  %v619_v42 = vld [vmem:[#allocation8 + $0x8] sm:$0xff]   ;;  %v620_v43 = vld [vmem:[#allocation8] sm:$0xff]   ;;  %p717_p10 = pnand %p716_p9, %p710_p6 }
  0x3a   :  { %v480_v44 = vld [vmem:[%s858_s4] ss:$0 sm:$0xff] }
  0x3b   :  { %v489_v62 = vld [vmem:[%s860_s6] ss:$0 sm:$0xff] }
  0x3c   :  { %530 = vmatpush3.bf16.msra.mxu0 %v598_v3  ;;  %550 = vmatpush3.bf16.msra.mxu1 %v607_v12 }
  0x3d   :  { %531 = vmatprep.subr.bf16.mxu0 %v743_v0  ;;  %551 = vmatprep.subr.bf16.mxu1 %v743_v0 }
  0x40   :  { %532 = vmatpush3.bf16.msra.mxu0 %v599_v5  ;;  %552 = vmatpush3.bf16.msra.mxu1 %v608_v13 }
  0x41   :  { %533 = vmatprep.subr.bf16.mxu0 %v743_v0  ;;  %553 = vmatprep.subr.bf16.mxu1 %v743_v0 }
  0x44   :  { %534 = vmatpush3.bf16.msra.mxu0 %v600_v6  ;;  %554 = vmatpush3.bf16.msra.mxu1 %v609_v14 }
  0x45   :  { %535 = vmatprep.subr.bf16.mxu0 %v743_v0  ;;  %555 = vmatprep.subr.bf16.mxu1 %v743_v0 }
  0x48   :  { %536 = vmatpush3.bf16.msra.mxu0 %v601_v7  ;;  %556 = vmatpush3.bf16.msra.mxu1 %v610_v15 }
  0x49   :  { %537 = vmatprep.subr.bf16.mxu0 %v743_v0  ;;  %557 = vmatprep.subr.bf16.mxu1 %v743_v0 }
  0x4c   :  { %538 = vmatpush3.bf16.msra.mxu0 %v602_v8  ;;  %558 = vmatpush3.bf16.msra.mxu1 %v611_v16 }
  0x4d   :  { %539 = vmatprep.subr.bf16.mxu0 %v743_v0  ;;  %559 = vmatprep.subr.bf16.mxu1 %v743_v0 }
  0x50   :  { %540 = vmatpush3.bf16.msra.mxu0 %v603_v9  ;;  %560 = vmatpush3.bf16.msra.mxu1 %v612_v17 }
  0x51   :  { %565 = vmatprep.subr.bf16.mxu0 %v743_v0 }
  0x53   :  { %542 = vmatmul.mubr.bf16.vlgmr.msra.gmra.mxu0 %v604_v10 }
  0x54   :  { %581 = vmatprep.mubr.msk.bf16.mxu0 %vm744_vm0, %v743_v0  ;;  %566 = vmatpush3.bf16.msra.mxu0 %v613_v18 }
  0x55   :  { %567 = vmatprep.subr.bf16.mxu0 %v743_v0 }
  0x58   :  { %568 = vmatpush3.bf16.msra.mxu0 %v614_v37 }
  0x59   :  { %569 = vmatprep.subr.bf16.mxu0 %v743_v0 }
  0x5c   :  { %570 = vmatpush3.bf16.msra.mxu0 %v615_v38 }
  0x5d   :  { %571 = vmatprep.subr.bf16.mxu0 %v743_v0 }
  0x60   :  { %572 = vmatpush3.bf16.msra.mxu0 %v616_v39 }
  0x61   :  { %573 = vmatprep.subr.bf16.mxu0 %v743_v0 }
  0x64   :  { %574 = vmatpush3.bf16.msra.mxu0 %v617_v40 }
  0x65   :  { %575 = vmatprep.subr.bf16.mxu0 %v743_v0 }
  0x68   :  { %576 = vmatpush3.bf16.msra.mxu0 %v618_v41 }
  0x69   :  { %577 = vmatprep.subr.bf16.mxu0 %v743_v0 }
  0x6c   :  { %578 = vmatpush3.bf16.msra.mxu0 %v619_v42 }
  0x6d   :  { %579 = vmatprep.subr.bf16.mxu0 %v743_v0 }
  0x70   :  { %580 = vmatpush3.bf16.msra.mxu0 %v620_v43 }
 0x113   :  { %v196_v20 = vpop.f32.mrf.mxu0 }
 0x114   :  { %v197_v21 = vadd.f32 %v470_v19, %v196_v20 }
 0x115   :  { %v543_v22 = vpop.f32.mrf.mxu0 }
 0x116   :  { %v205_v23 = vmul.f32 0.70710677, %v197_v21  ;;  %v203_v31 = vmul.f32 0.5, %v197_v21 }
 0x117   :  { %v199_v24 = vpop.f32.mrf.mxu0 }
 0x118   :  { %621 = verf.f32 %v205_v23  ;;  %v200_v25 = vadd.f32 %v470_v19, %v199_v24 }
 0x119   :  { %v544_v26 = vpop.f32.mrf.mxu0 }
 0x11a   :  { %v206_v27 = vmul.f32 0.70710677, %v200_v25  ;;  %v204_v32 = vmul.f32 0.5, %v200_v25 }
 0x11c   :  { %623 = verf.f32 %v206_v27 }
 0x125   :  { %v622_v28 = vpop.eup %621 }
 0x126   :  { %v209_v29 = vadd.f32 1.0, %v622_v28 }
 0x128   :  { %v211_v34 = vmul.f32 %v209_v29, %v203_v31 }
 0x129   :  { %v624_v30 = vpop.eup %623 }
 0x12a   :  { %v210_v33 = vadd.f32 1.0, %v624_v30 }
 0x12c   :  { %v212_v35 = vmul.f32 %v210_v33, %v204_v32 }
 0x12e   :  { %v213_v36 = vpack.c.bf16 %v212_v35, %v211_v34 }
 0x130   :  { %562 = vmatmul.mubr.bf16.vlgmr.msra.gmra.mxu1 %v213_v36 }
 0x1f0   :  { %v319_v45 = vpop.f32.mrf.mxu1 }
 0x1f1   :  { %v320_v46 = vadd.f32 %v480_v44, %v319_v45 }
 0x1f2   :  { %v563_v47 = vpop.f32.mrf.mxu1 }
 0x1f3   :  { %v328_v48 = vmul.f32 0.70710677, %v320_v46  ;;  %v326_v56 = vmul.f32 0.5, %v320_v46 }
 0x1f4   :  { %v322_v49 = vpop.f32.mrf.mxu1 }
 0x1f5   :  { %625 = verf.f32 %v328_v48  ;;  %v323_v50 = vadd.f32 %v480_v44, %v322_v49 }
 0x1f6   :  { %v564_v51 = vpop.f32.mrf.mxu1 }
 0x1f7   :  { %v329_v52 = vmul.f32 0.70710677, %v323_v50  ;;  %v327_v57 = vmul.f32 0.5, %v323_v50 }
 0x1f9   :  { %627 = verf.f32 %v329_v52 }
 0x202   :  { %v626_v53 = vpop.eup %625 }
 0x203   :  { %v332_v54 = vadd.f32 1.0, %v626_v53 }
 0x205   :  { %v334_v59 = vmul.f32 %v332_v54, %v326_v56 }
 0x206   :  { %v628_v55 = vpop.eup %627 }
 0x207   :  { %v333_v58 = vadd.f32 1.0, %v628_v55 }
 0x209   :  { %v335_v60 = vmul.f32 %v333_v58, %v327_v57 }
 0x20b   :  { %v336_v61 = vpack.c.bf16 %v335_v60, %v334_v59 }
 0x20d   :  { %582 = vmatmul.mubr.bf16.vlgmr.msra.gmra.mxu0 %v336_v61 }
 0x2cd   :  { %v442_v63 = vpop.f32.mrf.mxu0 }
 0x2ce   :  { %v443_v0 = vadd.f32 %v489_v62, %v442_v63 }
 0x2cf   :  { %v583_v1 = vpop.f32.mrf.mxu0 }
 0x2d0   :  { %449 = vst [vmem:[#allocation10] sm:$0xff] %v443_v0 }
 0x2d1   :  { %v445_v2 = vpop.f32.mrf.mxu0 }
 0x2d2   :  { %v446_v3 = vadd.f32 %v489_v62, %v445_v2 }
 0x2d3   :  { %v584_v4 = vpop.f32.mrf.mxu0 }
 0x2d4   :  { %450 = vst [vmem:[#allocation10 + $0x8] sm:$0xff] %v446_v3 }
 0x2d5   :  { %720 = shalt.err (!%p717_p10)
}
 0x2d6   :  { %s746_s26 = smov 128   ;;  %s747_s6 = smov 8  }
 0x2d7   :  { %462 = dma.vmem_to_hbm [thread:$0]  %s457_s24, 256, %s861_s7, [#allocation4], %s746_s26, %s746_s26, %s747_s6  }
 0x2d8   :  { %735 = dma.done.wait [#allocation4], 256  }
 0x2d9   :  { %736 = vsyncadd [#allocation4], 4294967040 }
 0x2da   :  { %466 = vsyncpa [#allocation3], 1 }
 0x2db   :  { %467 = vsyncpa [#allocation6], 1 }
 0x2dc   :  { %468 = vsyncpa [#allocation9], 1 }
 0x2dd   :  { %469 = vsyncpa [#allocation4], 1 }

</bundles_post_ra>
